<compile_context>
chip_gen: v5e
topology: v5e:2x2
jax: 0.10.0
libtpu: 0.0.40
codegen_flags: <defaults>
</compile_context>

<pallas_src>
import functools

import jax
import jax.numpy as jnp
from jax.experimental import pallas as pl
from jax.experimental.pallas import tpu as pltpu

LANE = 128
SUBLANE = 8


def _round_up(n, m):
    return (n + m - 1) // m * m


def _cdiv(a, b):
    return -(-a // b)


def _default_tile_rows():
    """Target batch rows per grid step, per TPU generation."""
    try:
        kind = jax.devices()[0].device_kind.lower()
    except Exception:
        return 1024
    # v5e / v6e: 128 MiB VMEM, single TensorCore -> large tiles amortize the
    # per-step pipeline overhead.  Default (v7x etc.): 64 MiB VMEM, 2 TCs ->
    # moderate tiles so the parallel batch axis keeps >=2 steps to shard.
    if "v5" in kind or "v6" in kind:
        return 4096
    return 1024


def _simplenet_kernel(xt_ref, w1t_ref, b1_ref, w2t_ref, b2_ref, w3t_ref,
                      b3_ref, o_ref, *, out_d):
    """Fused forward for one batch tile; feature-major (features, tile_b)."""
    xt = xt_ref[...]                                   # (in_s, tile_b) bf16

    # fc1 + bias + ReLU (bf16 operands -> f32 accumulate on the MXU),
    # downcast once to bf16 for the next matmul.
    h = jnp.dot(w1t_ref[...], xt, preferred_element_type=jnp.float32)
    h = jnp.maximum(h + b1_ref[...], 0.0).astype(jnp.bfloat16)

    # dropout: identity in eval mode.
    # TODO(synk): training-mode dropout would need pltpu.prng_seed +
    #             pltpu.stateful_bernoulli here.

    # fc2 + bias + ReLU
    h = jnp.dot(w2t_ref[...], h, preferred_element_type=jnp.float32)
    h = jnp.maximum(h + b2_ref[...], 0.0).astype(jnp.bfloat16)

    # fc3 + bias + sigmoid; only the real output rows are stored, lane-dense:
    # (out_d, tile_b) with the batch on the 128-lane axis.
    h = jnp.dot(w3t_ref[...], h, preferred_element_type=jnp.float32)
    h = h + b3_ref[...]
    o_ref[...] = jax.nn.sigmoid(h[:out_d, :]).astype(o_ref.dtype)


def prepare_params(params):
    """Transpose weights to feature-major, pad feature dims, cast MXU operands
    to bf16 (biases stay f32).  Done once, outside the kernel."""
    in_d, hid_d = params["w1"].shape
    out_d = params["w3"].shape[1]
    in_s = _round_up(in_d, SUBLANE)     # sublane pad only -- never to 128 lanes
    hid_p = _round_up(hid_d, LANE)
    out_s = _round_up(out_d, SUBLANE)

    def pad_t(w, rows, cols):           # w -> w.T zero-padded to (rows, cols)
        wt = w.T
        return jnp.pad(wt, ((0, rows - wt.shape[0]), (0, cols - wt.shape[1])))

    def pad_col(b, rows):               # bias (n,) -> (rows, 1) f32 column
        bc = b.reshape(-1, 1).astype(jnp.float32)
        return jnp.pad(bc, ((0, rows - bc.shape[0]), (0, 0)))

    return {
        "w1t": pad_t(params["w1"], hid_p, in_s).astype(jnp.bfloat16),
        "b1": pad_col(params["b1"], hid_p),
        "w2t": pad_t(params["w2"], hid_p, hid_p).astype(jnp.bfloat16),
        "b2": pad_col(params["b2"], hid_p),
        "w3t": pad_t(params["w3"], out_s, hid_p).astype(jnp.bfloat16),
        "b3": pad_col(params["b3"], out_s),
        # Plain Python ints, passed to the jitted wrapper as STATIC args (the
        # previous version leaked them through the traced pytree, which broke
        # jnp.pad with a ConcretizationTypeError).
        "dims": (int(in_d), int(hid_d), int(out_d)),
    }


@functools.partial(jax.jit, static_argnames=("dims", "tile_rows"))
def _forward(x, w1t, b1, w2t, b2, w3t, b3, *, dims, tile_rows):
    in_d, _, out_d = dims
    in_s = w1t.shape[1]
    batch = x.shape[0]

    # Batch tiling: size the tile from the batch itself (waste bounded by a
    # few 128-lane groups).  Keep the step count even when >1 so both v7x
    # TensorCores get work on the "parallel" axis (rounding down -> slightly
    # larger tiles, which also suits v5e/v6e).
    n_steps = max(1, _cdiv(batch, tile_rows))
    if n_steps > 1 and n_steps % 2:
        n_steps -= 1
    tile_b = _round_up(_cdiv(batch, n_steps), LANE)
    batch_p = tile_b * n_steps

    # x^T: (in_s, batch_p) bf16 -- feature dim stays at its sublane-padded
    # size (8 for in_d=8); batch goes on the lane axis.
    xt = jnp.pad(x.astype(jnp.bfloat16).T,
                 ((0, in_s - in_d), (0, batch_p - batch)))

    # Weights/biases: constant index_map -> stay VMEM-resident across steps.
    const = lambda a: pl.BlockSpec(a.shape, lambda i: (0, 0))

    out = pl.pallas_call(
        functools.partial(_simplenet_kernel, out_d=out_d),
        out_shape=jax.ShapeDtypeStruct((out_d, batch_p), jnp.float32),
        grid=(n_steps,),
        in_specs=[
            pl.BlockSpec((in_s, tile_b), lambda i: (0, i)),   # x^T streamed
            const(w1t), const(b1),
            const(w2t), const(b2),
            const(w3t), const(b3),
        ],
        out_specs=pl.BlockSpec((out_d, tile_b), lambda i: (0, i)),
        compiler_params=pltpu.CompilerParams(
            dimension_semantics=("parallel",),    # megacore sharding on v7x
        ),
    )(xt, w1t, b1, w2t, b2, w3t, b3)

    # Layout plumbing only: strip the batch padding, back to (batch, out_d).
    # NOTE: padded batch columns hold sigmoid(bias) garbage -- never consume
    # `out` without this slice.
    return out[:, :batch].T


def simplenet_forward(x, prepared, *, tile_rows=None):
    """x: [batch, input_dim] float32.  prepared: output of prepare_params."""
    if tile_rows is None:
        tile_rows = _default_tile_rows()
    return _forward(x, prepared["w1t"], prepared["b1"], prepared["w2t"],
                    prepared["b2"], prepared["w3t"], prepared["b3"],
                    dims=prepared["dims"], tile_rows=int(tile_rows))


def init_params(key, input_dim, hidden_dim, output_dim):
    """Deterministic init mimicking nn.Linear's U(-1/sqrt(fan_in), ...)."""
    ks = jax.random.split(key, 6)

    def linear(kw, kb, fan_in, fan_out):
        bound = 1.0 / jnp.sqrt(fan_in)
        w = jax.random.uniform(kw, (fan_in, fan_out), jnp.float32, -bound, bound)
        b = jax.random.uniform(kb, (fan_out,), jnp.float32, -bound, bound)
        return w, b

    w1, b1 = linear(ks[0], ks[1], input_dim, hidden_dim)
    w2, b2 = linear(ks[2], ks[3], hidden_dim, hidden_dim)
    w3, b3 = linear(ks[4], ks[5], hidden_dim, output_dim)
    return {"w1": w1, "b1": b1, "w2": w2, "b2": b2, "w3": w3, "b3": b3}


def reference_forward(x, p):
    """Full-f32 plain-JAX reference (matches the PyTorch eval-mode forward)."""
    h = jnp.maximum(x @ p["w1"] + p["b1"], 0.0)
    h = jnp.maximum(h @ p["w2"] + p["b2"], 0.0)
    return jax.nn.sigmoid(h @ p["w3"] + p["b3"])


if __name__ == "__main__":
    key = jax.random.PRNGKey(0)
    k_x, k_p = jax.random.split(key)

    batch, input_dim, hidden_dim, output_dim = 8, 8, 32, 1

    x = jax.random.normal(k_x, (batch, input_dim), jnp.float32)
    params = init_params(k_p, input_dim, hidden_dim, output_dim)
    prepared = prepare_params(params)

    out = jax.block_until_ready(simplenet_forward(x, prepared))
    ref = reference_forward(x, params)
    assert out.shape == (batch, output_dim), out.shape
    # bf16 MXU operands vs a true f32 reference: ~1% relative error on the
    # logits, <1e-2 absolute after the sigmoid -> 2e-2 atol is safe.
    assert jnp.allclose(out, ref, atol=2e-2), (out, ref)

    # Multi-tile, non-divisible batch: exercises the grid path, batch padding,
    # weight residency across grid steps and the lane-packed output.
    x_big = jax.random.normal(k_x, (1037, input_dim), jnp.float32)
    out_big = jax.block_until_ready(
        simplenet_forward(x_big, prepared, tile_rows=512))
    ref_big = reference_forward(x_big, params)
    assert out_big.shape == (1037, output_dim), out_big.shape
    assert jnp.allclose(out_big, ref_big, atol=2e-2)

    print("KERNEL_OK")
</pallas_src>

<mosaic_0001>
module attributes {stable_mosaic.version = 11 : i64} {
  func.func @_simplenet_kernel(%arg0: i32, %arg1: memref<8x128xbf16, #tpu.memory_space<vmem>>, %arg2: memref<128x8xbf16, #tpu.memory_space<vmem>>, %arg3: memref<128x1xf32, #tpu.memory_space<vmem>>, %arg4: memref<128x128xbf16, #tpu.memory_space<vmem>>, %arg5: memref<128x1xf32, #tpu.memory_space<vmem>>, %arg6: memref<8x128xbf16, #tpu.memory_space<vmem>>, %arg7: memref<8x1xf32, #tpu.memory_space<vmem>>, %arg8: memref<1x128xf32, #tpu.memory_space<vmem>>) attributes {dimension_semantics = [#tpu.dimension_semantics<parallel>], iteration_bounds = array<i64: 1>, scalar_prefetch = 0 : i64, scratch_operands = 0 : i64, tpu.core_type = #tpu.core_type<tc>, window_params = [{transform_indices = @transform_0, window_bounds = array<i64: 8, 128>}, {pipeline_mode = #tpu.pipeline_mode<synchronous>, transform_indices = @transform_1, window_bounds = array<i64: 128, 8>}, {pipeline_mode = #tpu.pipeline_mode<synchronous>, transform_indices = @transform_2, window_bounds = array<i64: 128, 1>}, {pipeline_mode = #tpu.pipeline_mode<synchronous>, transform_indices = @transform_3, window_bounds = array<i64: 128, 128>}, {pipeline_mode = #tpu.pipeline_mode<synchronous>, transform_indices = @transform_4, window_bounds = array<i64: 128, 1>}, {pipeline_mode = #tpu.pipeline_mode<synchronous>, transform_indices = @transform_5, window_bounds = array<i64: 8, 128>}, {pipeline_mode = #tpu.pipeline_mode<synchronous>, transform_indices = @transform_6, window_bounds = array<i64: 8, 1>}, {transform_indices = @transform_7, window_bounds = array<i64: 1, 128>}]} {
    %c0 = arith.constant 0 : index
    %c0_0 = arith.constant 0 : index
    %0 = vector.load %arg1[%c0, %c0_0] : memref<8x128xbf16, #tpu.memory_space<vmem>>, vector<8x128xbf16>
    %c0_1 = arith.constant 0 : index
    %c0_2 = arith.constant 0 : index
    %1 = vector.load %arg2[%c0_1, %c0_2] : memref<128x8xbf16, #tpu.memory_space<vmem>>, vector<128x8xbf16>
    %cst = arith.constant dense<0.000000e+00> : vector<128x128xf32>
    %2 = tpu.matmul %1, %0, %cst {dimension_numbers = #tpu.dot_dimension_numbers<[1], [0], [0], [1], [0, 0, 1, 1], [], []>} : vector<128x8xbf16>, vector<8x128xbf16>, vector<128x128xf32> -> vector<128x128xf32>
    %c0_3 = arith.constant 0 : index
    %c0_4 = arith.constant 0 : index
    %3 = vector.load %arg3[%c0_3, %c0_4] : memref<128x1xf32, #tpu.memory_space<vmem>>, vector<128x1xf32>
    %4 = vector.broadcast %3 : vector<128x1xf32> to vector<128x128xf32>
    %5 = arith.addf %2, %4 : vector<128x128xf32>
    %cst_5 = arith.constant 0.000000e+00 : f32
    %6 = vector.broadcast %cst_5 : f32 to vector<128x128xf32>
    %7 = arith.maximumf %5, %6 : vector<128x128xf32>
    %8 = arith.truncf %7 : vector<128x128xf32> to vector<128x128xbf16>
    %c0_6 = arith.constant 0 : index
    %c0_7 = arith.constant 0 : index
    %9 = vector.load %arg4[%c0_6, %c0_7] : memref<128x128xbf16, #tpu.memory_space<vmem>>, vector<128x128xbf16>
    %cst_8 = arith.constant dense<0.000000e+00> : vector<128x128xf32>
    %10 = tpu.matmul %9, %8, %cst_8 {dimension_numbers = #tpu.dot_dimension_numbers<[1], [0], [0], [1], [0, 0, 1, 1], [], []>} : vector<128x128xbf16>, vector<128x128xbf16>, vector<128x128xf32> -> vector<128x128xf32>
    %c0_9 = arith.constant 0 : index
    %c0_10 = arith.constant 0 : index
    %11 = vector.load %arg5[%c0_9, %c0_10] : memref<128x1xf32, #tpu.memory_space<vmem>>, vector<128x1xf32>
    %12 = vector.broadcast %11 : vector<128x1xf32> to vector<128x128xf32>
    %13 = arith.addf %10, %12 : vector<128x128xf32>
    %cst_11 = arith.constant 0.000000e+00 : f32
    %14 = vector.broadcast %cst_11 : f32 to vector<128x128xf32>
    %15 = arith.maximumf %13, %14 : vector<128x128xf32>
    %16 = arith.truncf %15 : vector<128x128xf32> to vector<128x128xbf16>
    %c0_12 = arith.constant 0 : index
    %c0_13 = arith.constant 0 : index
    %17 = vector.load %arg6[%c0_12, %c0_13] : memref<8x128xbf16, #tpu.memory_space<vmem>>, vector<8x128xbf16>
    %cst_14 = arith.constant dense<0.000000e+00> : vector<8x128xf32>
    %18 = tpu.matmul %17, %16, %cst_14 {dimension_numbers = #tpu.dot_dimension_numbers<[1], [0], [0], [1], [0, 0, 1, 1], [], []>} : vector<8x128xbf16>, vector<128x128xbf16>, vector<8x128xf32> -> vector<8x128xf32>
    %c0_15 = arith.constant 0 : index
    %c0_16 = arith.constant 0 : index
    %19 = vector.load %arg7[%c0_15, %c0_16] : memref<8x1xf32, #tpu.memory_space<vmem>>, vector<8x1xf32>
    %20 = vector.broadcast %19 : vector<8x1xf32> to vector<8x128xf32>
    %21 = arith.addf %18, %20 : vector<8x128xf32>
    %22 = vector.extract_strided_slice %21 {offsets = [0, 0], sizes = [1, 128], strides = [1, 1]} : vector<8x128xf32> to vector<1x128xf32>
    %23 = arith.negf %22 : vector<1x128xf32>
    %24 = math.exp %23 : vector<1x128xf32>
    %cst_17 = arith.constant 1.000000e+00 : f32
    %25 = vector.broadcast %cst_17 : f32 to vector<1x128xf32>
    %26 = arith.addf %25, %24 : vector<1x128xf32>
    %27 = arith.divf %25, %26 : vector<1x128xf32>
    %c0_18 = arith.constant 0 : index
    %c0_19 = arith.constant 0 : index
    %28 = vector.load %arg8[%c0_18, %c0_19] : memref<1x128xf32, #tpu.memory_space<vmem>>, vector<1x128xf32>
    tpu.vector_store %arg8[%c0_18, %c0_19], %27 {strides = array<i32>} : memref<1x128xf32, #tpu.memory_space<vmem>>, vector<1x128xf32>,
    return
  }
  func.func @transform_0(%arg0: i32) -> (i32, i32) {
    %c0_i32 = arith.constant 0 : i32
    %c0_i32_0 = arith.constant 0 : i32
    return %c0_i32, %arg0 : i32, i32
  }
  func.func @transform_1(%arg0: i32) -> (i32, i32) {
    %c0_i32 = arith.constant 0 : i32
    %c0_i32_0 = arith.constant 0 : i32
    %c0_i32_1 = arith.constant 0 : i32
    return %c0_i32, %c0_i32_0 : i32, i32
  }
  func.func @transform_2(%arg0: i32) -> (i32, i32) {
    %c0_i32 = arith.constant 0 : i32
    %c0_i32_0 = arith.constant 0 : i32
    %c0_i32_1 = arith.constant 0 : i32
    return %c0_i32, %c0_i32_0 : i32, i32
  }
  func.func @transform_3(%arg0: i32) -> (i32, i32) {
    %c0_i32 = arith.constant 0 : i32
    %c0_i32_0 = arith.constant 0 : i32
    %c0_i32_1 = arith.constant 0 : i32
    return %c0_i32, %c0_i32_0 : i32, i32
  }
  func.func @transform_4(%arg0: i32) -> (i32, i32) {
    %c0_i32 = arith.constant 0 : i32
    %c0_i32_0 = arith.constant 0 : i32
    %c0_i32_1 = arith.constant 0 : i32
    return %c0_i32, %c0_i32_0 : i32, i32
  }
  func.func @transform_5(%arg0: i32) -> (i32, i32) {
    %c0_i32 = arith.constant 0 : i32
    %c0_i32_0 = arith.constant 0 : i32
    %c0_i32_1 = arith.constant 0 : i32
    return %c0_i32, %c0_i32_0 : i32, i32
  }
  func.func @transform_6(%arg0: i32) -> (i32, i32) {
    %c0_i32 = arith.constant 0 : i32
    %c0_i32_0 = arith.constant 0 : i32
    %c0_i32_1 = arith.constant 0 : i32
    return %c0_i32, %c0_i32_0 : i32, i32
  }
  func.func @transform_7(%arg0: i32) -> (i32, i32) {
    %c0_i32 = arith.constant 0 : i32
    %c0_i32_0 = arith.constant 0 : i32
    return %c0_i32, %arg0 : i32, i32
  }
}

</mosaic_0001>

<bundles_post_ra>
// kernel: _forward.1
= control target key start
LH: loop header
LB: loop body
LE: loop exit
PB: predicated region body
PF: predicated region fallthrough
CT: control target
= control target key end

     0   :  { %vm205_vm0 = vcmask 1043456   ;;  %v665_v0 = vmov 0   ;;  %vm180_vm1 = vcmask 64512   ;;  %s876_s2 = inlined_call_operand.vmem [shape: f32[128,1], index: 2, kind: input, shape index: {}]   ;;  %s877_s0 = inlined_call_operand.vmem [shape: bf16[8,128], index: 0, kind: input, shape index: {}]   ;;  %s878_s1 = inlined_call_operand.vmem [shape: bf16[128,8], index: 1, kind: input, shape index: {}]   ;;  %s879_s4 = inlined_call_operand.vmem [shape: f32[128,1], index: 4, kind: input, shape index: {}]   ;;  %s880_s6 = inlined_call_operand.vmem [shape: f32[8,1], index: 6, kind: input, shape index: {}]   ;;  %s881_s3 = inlined_call_operand.vmem [shape: bf16[128,128], index: 3, kind: input, shape index: {}]   ;;  %s882_s5 = inlined_call_operand.vmem [shape: bf16[8,128], index: 5, kind: input, shape index: {}]   ;;  %s883_s7 = inlined_call_operand.vmem [shape: f32[1,128], index: 7, kind: output, shape index: {}]  }
   0x1   :  { %658 = vset.pattern.permute.xlu0 %v665_v0  ;;  %v58_v1 = vld [vmem:[%s876_s2 + $0x70] sm:$0xff]  ;;  %v27_v2 = vld [vmem:[%s877_s0] sm:$0xf]  ;;  %660 = vset.pattern.permute.xlu2 %v665_v0  ;;  %v59_v8 = vld [vmem:[%s876_s2 + $0x78] sm:$0xff] }
   0x2   :  { %132 = vperm.xlu0 %658, %v58_v1   ;;  %v207_v3 = vsel %vm205_vm0, %v27_v2, 0  ;;  %v632_v4 = vld [vmem:[%s878_s1] sm:$0xff]  ;;  %659 = vset.pattern.permute.xlu1 %v665_v0  ;;  %v54_v6 = vld [vmem:[%s876_s2 + $0x50] sm:$0xff]  ;;  %v57_v9 = vld [vmem:[%s876_s2 + $0x68] sm:$0xff] }
   0x3   :  { %v56_v5 = vld [vmem:[%s876_s2 + $0x60] sm:$0xff]  ;;  %216 = vmatpush.bf16.msra.mxu0 %v207_v3  ;;  %112 = vperm.xlu2 %660, %v54_v6   ;;  %v638_v7 = vld [vmem:[%s878_s1 + $0x30] sm:$0xff]  ;;  %v55_v10 = vld [vmem:[%s876_s2 + $0x58] sm:$0xff] }
   0x4   :  { %122 = vperm.xlu1 %659, %v56_v5   ;;  %648 = vmatpush.bf16.msra.mxu2 %v207_v3  ;;  %v52_v11 = vld [vmem:[%s876_s2 + $0x40] sm:$0xff]  ;;  %v53_v12 = vld [vmem:[%s876_s2 + $0x48] sm:$0xff]  ;;  %v50_v13 = vld [vmem:[%s876_s2 + $0x30] sm:$0xff] }
   0x5   :  { %v633_v14 = vld [vmem:[%s878_s1 + $0x8] sm:$0xff]  ;;  %v639_v15 = vld [vmem:[%s878_s1 + $0x38] sm:$0xff]  ;;  %v48_v17 = vld [vmem:[%s876_s2 + $0x20] sm:$0xff] }
   0x6   :  { %591 = vmatmul.msk.bf16.vlgmr.msra.gmra.mxu0 %vm180_vm1, %v632_v4  ;;  %v51_v16 = vld [vmem:[%s876_s2 + $0x38] sm:$0xff]  ;;  %v49_v18 = vld [vmem:[%s876_s2 + $0x28] sm:$0xff]  ;;  %v46_v19 = vld [vmem:[%s876_s2 + $0x10] sm:$0xff] }
   0x7   :  { %597 = vmatmul.msk.bf16.vlgmr.msra.gmra.mxu2 %vm180_vm1, %v638_v7  ;;  %v47_v20 = vld [vmem:[%s876_s2 + $0x18] sm:$0xff]  ;;  %v44_v21 = vld [vmem:[%s876_s2] sm:$0xff]  ;;  %v634_v22 = vld [vmem:[%s878_s1 + $0x10] sm:$0xff] }
   0x8   :  { %v45_v23 = vld [vmem:[%s876_s2 + $0x8] sm:$0xff]  ;;  %v312_v24 = vld [vmem:[%s879_s4 + $0x70] sm:$0xff]  ;;  %v313_v25 = vld [vmem:[%s879_s4 + $0x78] sm:$0xff] }
   0x9   :  { %v310_v26 = vld [vmem:[%s879_s4 + $0x60] sm:$0xff]  ;;  %v311_v27 = vld [vmem:[%s879_s4 + $0x68] sm:$0xff]  ;;  %v635_v28 = vld [vmem:[%s878_s1 + $0x18] sm:$0xff] }
   0xa   :  { %137 = vperm.xlu0 %658, %v59_v8   ;;  %v308_v29 = vld [vmem:[%s879_s4 + $0x50] sm:$0xff]  ;;  %v309_v30 = vld [vmem:[%s879_s4 + $0x58] sm:$0xff]  ;;  %v306_v31 = vld [vmem:[%s879_s4 + $0x40] sm:$0xff] }
   0xb   :  { %117 = vperm.xlu2 %660, %v55_v10   ;;  %v307_v32 = vld [vmem:[%s879_s4 + $0x48] sm:$0xff]  ;;  %v304_v33 = vld [vmem:[%s879_s4 + $0x30] sm:$0xff]  ;;  %v305_v34 = vld [vmem:[%s879_s4 + $0x38] sm:$0xff] }
   0xc   :  { %127 = vperm.xlu1 %659, %v57_v9   ;;  %v302_v35 = vld [vmem:[%s879_s4 + $0x20] sm:$0xff]  ;;  %v303_v37 = vld [vmem:[%s879_s4 + $0x28] sm:$0xff]  ;;  %v300_v38 = vld [vmem:[%s879_s4 + $0x10] sm:$0xff] }
   0xd   :  { %v636_v36 = vld [vmem:[%s878_s1 + $0x20] sm:$0xff]  ;;  %v301_v39 = vld [vmem:[%s879_s4 + $0x18] sm:$0xff]  ;;  %v299_v41 = vld [vmem:[%s879_s4 + $0x8] sm:$0xff] }
   0xe   :  { %v298_v40 = vld [vmem:[%s879_s4] sm:$0xff]  ;;  %v637_v42 = vld [vmem:[%s878_s1 + $0x28] sm:$0xff] }
   0xf   :  { %v516_v43 = vld [vmem:[%s880_s6] sm:$0xff] }
  0x12   :  { %102 = vperm.xlu0 %658, %v52_v11  }
  0x13   :  { %92 = vperm.xlu2 %660, %v50_v13  }
  0x14   :  { %107 = vperm.xlu1 %659, %v53_v12  }
  0x16   :  { %592 = vmatmul.msk.bf16.gmra.mxu0 %vm180_vm1, %v633_v14 }
  0x17   :  { %598 = vmatmul.msk.bf16.gmra.mxu2 %vm180_vm1, %v639_v15 }
  0x1a   :  { %97 = vperm.xlu0 %658, %v51_v16  }
  0x1b   :  { %87 = vperm.xlu2 %660, %v49_v18  }
  0x1c   :  { %82 = vperm.xlu1 %659, %v48_v17  }
  0x22   :  { %72 = vperm.xlu0 %658, %v46_v19  }
  0x23   :  { %62 = vperm.xlu2 %660, %v44_v21  }
  0x24   :  { %77 = vperm.xlu1 %659, %v47_v20  }
  0x26   :  { %593 = vmatmul.msk.bf16.gmra.mxu0 %vm180_vm1, %v634_v22 }
  0x2a   :  { %67 = vperm.xlu0 %658, %v45_v23  }
  0x2b   :  { %391 = vperm.xlu2 %660, %v313_v25  }
  0x2c   :  { %386 = vperm.xlu1 %659, %v312_v24  }
  0x32   :  { %376 = vperm.xlu0 %658, %v310_v26  }
  0x33   :  { %366 = vperm.xlu2 %660, %v308_v29  }
  0x34   :  { %381 = vperm.xlu1 %659, %v311_v27  }
  0x36   :  { %594 = vmatmul.msk.bf16.gmra.mxu0 %vm180_vm1, %v635_v28 }
  0x3a   :  { %371 = vperm.xlu0 %658, %v309_v30  }
  0x3b   :  { %361 = vperm.xlu2 %660, %v307_v32  }
  0x3c   :  { %356 = vperm.xlu1 %659, %v306_v31  }
  0x42   :  { %346 = vperm.xlu0 %658, %v304_v33  }
  0x43   :  { %336 = vperm.xlu2 %660, %v302_v35  }
  0x44   :  { %351 = vperm.xlu1 %659, %v305_v34  }
  0x46   :  { %595 = vmatmul.msk.bf16.gmra.mxu0 %vm180_vm1, %v636_v36 }
  0x4a   :  { %341 = vperm.xlu0 %658, %v303_v37  }
  0x4b   :  { %331 = vperm.xlu2 %660, %v301_v39  }
  0x4c   :  { %326 = vperm.xlu1 %659, %v300_v38  }
  0x52   :  { %316 = vperm.xlu0 %658, %v298_v40  }
  0x53   :  { %519 = vperm.xlu2 %660, %v516_v43  }
  0x54   :  { %321 = vperm.xlu1 %659, %v299_v41  }
  0x56   :  { %596 = vmatmul.msk.bf16.gmra.mxu0 %vm180_vm1, %v637_v42 }
  0x5d   :  { %v113_v44 = vpop.permute.xlu2 %112 }
  0x65   :  { %v118_v47 = vpop.permute.xlu2 %117 }
  0x6d   :  { %v93_v51 = vpop.permute.xlu2 %92 }
  0x74   :  { %v133_v45 = vpop.permute.xlu0 %132 }
  0x75   :  { %v88_v57 = vpop.permute.xlu2 %87 }
  0x76   :  { %v123_v46 = vpop.permute.xlu1 %122 }
  0x7c   :  { %v138_v48 = vpop.permute.xlu0 %137 }
  0x7d   :  { %v63_v62 = vpop.permute.xlu2 %62 }
  0x7e   :  { %v128_v49 = vpop.permute.xlu1 %127 }
  0x83   :  { %v218_v50 = vpop.f32.mrf.mxu0 }
  0x84   :  { %v103_v52 = vpop.permute.xlu0 %102  ;;  %v219_v2 = vadd.f32 %v218_v50, %v63_v62 }
  0x86   :  { %v108_v53 = vpop.permute.xlu1 %107  ;;  %v258_v9 = vmax.f32 %v219_v2, 0.0 }
  0x8a   :  { %v248_v54 = vpop.f32.mrf.mxu2 }
  0x8b   :  { %v220_v55 = vpop.f32.mrf.mxu0  ;;  %v249_v13 = vadd.f32 %v248_v54, %v123_v46  ;;  %v641_v54 = vld [vmem:[%s881_s3 + $0x8] sm:$0xff] }
  0x8c   :  { %v98_v56 = vpop.permute.xlu0 %97 }
  0x8d   :  { %v270_v20 = vmax.f32 %v249_v13, 0.0 }
  0x8e   :  { %v83_v58 = vpop.permute.xlu1 %82 }
  0x92   :  { %v250_v59 = vpop.f32.mrf.mxu2 }
  0x93   :  { %v223_v60 = vpop.f32.mrf.mxu0  ;;  %v251_v14 = vadd.f32 %v250_v59, %v128_v49  ;;  %v647_v59 = vld [vmem:[%s881_s3 + $0x38] sm:$0xff] }
  0x94   :  { %v73_v61 = vpop.permute.xlu0 %72 }
  0x95   :  { %v224_v0 = vadd.f32 %v223_v60, %v73_v61  ;;  %v271_v21 = vmax.f32 %v251_v14, 0.0 }
  0x96   :  { %v78_v63 = vpop.permute.xlu1 %77 }
  0x97   :  { %v260_v7 = vmax.f32 %v224_v0, 0.0  ;;  %v280_v24 = vpack.c.bf16 %v271_v21, %v270_v20 }
  0x9a   :  { %v253_v1 = vpop.f32.mrf.mxu2 }
  0x9b   :  { %v225_v3 = vpop.f32.mrf.mxu0  ;;  %v254_v11 = vadd.f32 %v253_v1, %v133_v45 }
  0x9c   :  { %v226_v4 = vadd.f32 %v225_v3, %v78_v63  ;;  %v68_v5 = vpop.permute.xlu0 %67 }
  0x9d   :  { %v221_v6 = vadd.f32 %v220_v55, %v68_v5  ;;  %v272_v18 = vmax.f32 %v254_v11, 0.0  ;;  %v645_v55 = vld [vmem:[%s881_s3 + $0x28] sm:$0xff] }
  0x9e   :  { %v261_v8 = vmax.f32 %v226_v4, 0.0  ;;  %v387_v4 = vpop.permute.xlu1 %386 }
  0x9f   :  { %v259_v10 = vmax.f32 %v221_v6, 0.0  ;;  %v392_v6 = vpop.permute.xlu2 %391 }
  0xa0   :  { %v275_v12 = vpack.c.bf16 %v261_v8, %v260_v7 }
  0xa1   :  { %v274_v15 = vpack.c.bf16 %v259_v10, %v258_v9 }
  0xa2   :  { %v255_v16 = vpop.f32.mrf.mxu2 }
  0xa3   :  { %v228_v17 = vpop.f32.mrf.mxu0  ;;  %v256_v19 = vadd.f32 %v255_v16, %v138_v48 }
  0xa4   :  { %v229_v48 = vadd.f32 %v228_v17, %v83_v58  ;;  %v643_v58 = vld [vmem:[%s881_s3 + $0x18] sm:$0xff]  ;;  %v377_v10 = vpop.permute.xlu0 %376 }
  0xa5   :  { %v273_v22 = vmax.f32 %v256_v19, 0.0 }
  0xa6   :  { %v382_v8 = vpop.permute.xlu1 %381 }
  0xa7   :  { %v281_v23 = vpack.c.bf16 %v273_v22, %v272_v18  ;;  %v367_v11 = vpop.permute.xlu2 %366 }
  0xa9   :  { %442 = vmatpush.bf16.msra.mxu1 %v281_v23  ;;  %649 = vmatpush.bf16.msra.mxu3 %v281_v23 }
  0xab   :  { %v230_v25 = vpop.f32.mrf.mxu0 }
  0xac   :  { %v231_v43 = vadd.f32 %v230_v25, %v88_v57  ;;  %v646_v57 = vld [vmem:[%s881_s3 + $0x30] sm:$0xff] }
  0xad   :  { %443 = vmatpush.bf16.msra.mxu1 %v280_v24  ;;  %650 = vmatpush.bf16.msra.mxu3 %v280_v24 }
  0xae   :  { %v357_v14 = vpop.permute.xlu1 %356 }
  0xaf   :  { %v362_v16 = vpop.permute.xlu2 %361 }
  0xb3   :  { %v233_v26 = vpop.f32.mrf.mxu0 }
  0xb4   :  { %v234_v41 = vadd.f32 %v233_v26, %v93_v51  ;;  %v640_v51 = vld [vmem:[%s881_s3] sm:$0xff] }
  0xb6   :  { %v264_v49 = vmax.f32 %v234_v41, 0.0  ;;  %v352_v25 = vpop.permute.xlu1 %351 }
  0xbb   :  { %v235_v27 = vpop.f32.mrf.mxu0 }
  0xbc   :  { %v236_v38 = vadd.f32 %v235_v27, %v98_v56  ;;  %v642_v56 = vld [vmem:[%s881_s3 + $0x10] sm:$0xff] }
  0xbe   :  { %v265_v45 = vmax.f32 %v236_v38, 0.0 }
  0xc0   :  { %v277_v50 = vpack.c.bf16 %v265_v45, %v264_v49 }
  0xc3   :  { %v238_v28 = vpop.f32.mrf.mxu0 }
  0xc4   :  { %v239_v35 = vadd.f32 %v238_v28, %v103_v52 }
  0xc6   :  { %v266_v42 = vmax.f32 %v239_v35, 0.0  ;;  %v337_v35 = vpop.permute.xlu2 %336 }
  0xcb   :  { %v240_v29 = vpop.f32.mrf.mxu0 }
  0xcc   :  { %v241_v33 = vadd.f32 %v240_v29, %v108_v53  ;;  %v644_v53 = vld [vmem:[%s881_s3 + $0x20] sm:$0xff] }
  0xce   :  { %v267_v39 = vmax.f32 %v241_v33, 0.0 }
  0xd0   :  { %v278_v46 = vpack.c.bf16 %v267_v39, %v266_v42  ;;  %v327_v42 = vpop.permute.xlu1 %326 }
  0xd3   :  { %v243_v30 = vpop.f32.mrf.mxu0 }
  0xd4   :  { %v244_v31 = vadd.f32 %v243_v30, %v113_v44  ;;  %v263_v44 = vmax.f32 %v231_v43, 0.0 }
  0xd6   :  { %v268_v36 = vmax.f32 %v244_v31, 0.0 }
  0xdb   :  { %v245_v32 = vpop.f32.mrf.mxu0 }
  0xdc   :  { %v246_v34 = vadd.f32 %v245_v32, %v118_v47  ;;  %v262_v47 = vmax.f32 %v229_v48, 0.0 }
  0xde   :  { %v269_v37 = vmax.f32 %v246_v34, 0.0  ;;  %v276_v52 = vpack.c.bf16 %v263_v44, %v262_v47 }
  0xe0   :  { %v279_v40 = vpack.c.bf16 %v269_v37, %v268_v36 }
  0xe2   :  { %444 = vmatpush.bf16.msra.mxu1 %v279_v40  ;;  %651 = vmatpush.bf16.msra.mxu3 %v279_v40 }
  0xe6   :  { %445 = vmatpush.bf16.msra.mxu1 %v278_v46  ;;  %652 = vmatpush.bf16.msra.mxu3 %v278_v46 }
  0xea   :  { %446 = vmatpush.bf16.msra.mxu1 %v277_v50  ;;  %653 = vmatpush.bf16.msra.mxu3 %v277_v50 }
  0xee   :  { %447 = vmatpush.bf16.msra.mxu1 %v276_v52  ;;  %654 = vmatpush.bf16.msra.mxu3 %v276_v52  ;;  %v332_v52 = vpop.permute.xlu2 %331 }
  0xf2   :  { %448 = vmatpush.bf16.msra.mxu1 %v275_v12  ;;  %655 = vmatpush.bf16.msra.mxu3 %v275_v12 }
  0xf6   :  { %449 = vmatpush.bf16.msra.mxu1 %v274_v15  ;;  %656 = vmatpush.bf16.msra.mxu3 %v274_v15  ;;  %v372_v15 = vpop.permute.xlu0 %371 }
  0xf9   :  { %450 = vmatmul.bf16.vlgmr.msra.gmra.mxu1 %v640_v51  ;;  %470 = vmatmul.bf16.vlgmr.msra.gmra.mxu3 %v644_v53 }
  0xfe   :  { %v347_v29 = vpop.permute.xlu0 %346 }
 0x106   :  { %v342_v46 = vpop.permute.xlu0 %341 }
 0x109   :  { %455 = vmatmul.bf16.gmra.mxu1 %v641_v54  ;;  %475 = vmatmul.bf16.gmra.mxu3 %v645_v55 }
 0x119   :  { %460 = vmatmul.bf16.gmra.mxu1 %v642_v56  ;;  %480 = vmatmul.bf16.gmra.mxu3 %v646_v57  ;;  %v322_v57 = vpop.permute.xlu1 %321 }
 0x129   :  { %465 = vmatmul.bf16.gmra.mxu1 %v643_v58  ;;  %485 = vmatmul.bf16.gmra.mxu3 %v647_v59 }
 0x176   :  { %v864_v60 = vpop.f32.mrf.mxu1 }
 0x17c   :  { %v471_v61 = vpop.f32.mrf.mxu3 }
 0x17d   :  { %v472_v37 = vadd.f32 %v471_v61, %v357_v14 }
 0x17e   :  { %v866_v62 = vpop.f32.mrf.mxu1 }
 0x17f   :  { %v499_v43 = vmax.f32 %v472_v37, 0.0  ;;  %v454_v58 = vadd.f32 %v866_v62, %v322_v57 }
 0x184   :  { %v473_v63 = vpop.f32.mrf.mxu3 }
 0x185   :  { %v474_v32 = vadd.f32 %v473_v63, %v362_v16  ;;  %v317_v63 = vpop.permute.xlu0 %316 }
 0x186   :  { %v456_v0 = vpop.f32.mrf.mxu1 }
 0x187   :  { %v500_v39 = vmax.f32 %v474_v32, 0.0  ;;  %v457_v55 = vadd.f32 %v456_v0, %v327_v42  ;;  %v515_v0 = vld [vmem:[%s882_s5] sm:$0xf] }
 0x189   :  { %v511_v44 = vpack.c.bf16 %v500_v39, %v499_v43 }
 0x18c   :  { %v476_v1 = vpop.f32.mrf.mxu3 }
 0x18d   :  { %v477_v30 = vadd.f32 %v476_v1, %v367_v11  ;;  %v452_v1 = vadd.f32 %v864_v60, %v317_v63 }
 0x18e   :  { %v458_v3 = vpop.f32.mrf.mxu1 }
 0x18f   :  { %v501_v38 = vmax.f32 %v477_v30, 0.0  ;;  %v459_v51 = vadd.f32 %v458_v3, %v332_v52 }
 0x191   :  { %v494_v59 = vmax.f32 %v459_v51, 0.0 }
 0x194   :  { %v478_v2 = vpop.f32.mrf.mxu3 }
 0x195   :  { %v479_v26 = vadd.f32 %v478_v2, %v372_v15  ;;  %v493_v2 = vmax.f32 %v457_v55, 0.0 }
 0x196   :  { %v461_v7 = vpop.f32.mrf.mxu1 }
 0x197   :  { %v502_v33 = vmax.f32 %v479_v26, 0.0  ;;  %v462_v50 = vadd.f32 %v461_v7, %v337_v35  ;;  %v520_v7 = vpop.permute.xlu2 %519 }
 0x199   :  { %v512_v41 = vpack.c.bf16 %v502_v33, %v501_v38  ;;  %v495_v56 = vmax.f32 %v462_v50, 0.0 }
 0x19c   :  { %v481_v5 = vpop.f32.mrf.mxu3 }
 0x19d   :  { %v482_v22 = vadd.f32 %v481_v5, %v377_v10  ;;  %v508_v5 = vpack.c.bf16 %v494_v59, %v493_v2 }
 0x19e   :  { %v463_v12 = vpop.f32.mrf.mxu1 }
 0x19f   :  { %v503_v31 = vmax.f32 %v482_v22, 0.0  ;;  %v464_v48 = vadd.f32 %v463_v12, %v342_v46 }
 0x1a1   :  { %v496_v53 = vmax.f32 %v464_v48, 0.0 }
 0x1a3   :  { %v509_v61 = vpack.c.bf16 %v496_v53, %v495_v56 }
 0x1a4   :  { %v483_v9 = vpop.f32.mrf.mxu3 }
 0x1a5   :  { %v484_v20 = vadd.f32 %v483_v9, %v382_v8 }
 0x1a6   :  { %v466_v18 = vpop.f32.mrf.mxu1 }
 0x1a7   :  { %v504_v27 = vmax.f32 %v484_v20, 0.0  ;;  %v467_v45 = vadd.f32 %v466_v18, %v347_v29 }
 0x1a9   :  { %v513_v34 = vpack.c.bf16 %v504_v27, %v503_v31  ;;  %v497_v47 = vmax.f32 %v467_v45, 0.0 }
 0x1ac   :  { %v486_v13 = vpop.f32.mrf.mxu3 }
 0x1ad   :  { %v487_v17 = vadd.f32 %v486_v13, %v387_v4  ;;  %v492_v4 = vmax.f32 %v454_v58, 0.0 }
 0x1ae   :  { %v468_v36 = vpop.f32.mrf.mxu1 }
 0x1af   :  { %v505_v23 = vmax.f32 %v487_v17, 0.0  ;;  %v469_v40 = vadd.f32 %v468_v36, %v352_v25 }
 0x1b1   :  { %v498_v49 = vmax.f32 %v469_v40, 0.0 }
 0x1b3   :  { %v510_v54 = vpack.c.bf16 %v498_v49, %v497_v47 }
 0x1b4   :  { %v488_v19 = vpop.f32.mrf.mxu3 }
 0x1b5   :  { %v489_v21 = vadd.f32 %v488_v19, %v392_v6  ;;  %v491_v6 = vmax.f32 %v452_v1, 0.0 }
 0x1b7   :  { %v506_v24 = vmax.f32 %v489_v21, 0.0  ;;  %v507_v3 = vpack.c.bf16 %v492_v4, %v491_v6 }
 0x1b9   :  { %v514_v28 = vpack.c.bf16 %v506_v24, %v505_v23 }
 0x1bb   :  { %522 = vmatpush.bf16.msrb.mxu2 %v514_v28 }
 0x1bf   :  { %523 = vmatpush.bf16.msrb.mxu2 %v513_v34 }
 0x1c3   :  { %524 = vmatpush.bf16.msrb.mxu2 %v512_v41 }
 0x1c7   :  { %525 = vmatpush.bf16.msrb.mxu2 %v511_v44 }
 0x1cb   :  { %526 = vmatpush.bf16.msrb.mxu2 %v510_v54 }
 0x1cf   :  { %527 = vmatpush.bf16.msrb.mxu2 %v509_v61 }
 0x1d3   :  { %528 = vmatpush.bf16.msrb.mxu2 %v508_v5 }
 0x1d7   :  { %529 = vmatpush.bf16.msrb.mxu2 %v507_v3 }
 0x1da   :  { %530 = vmatmul.bf16.vlgmr.msrb.gmra.mxu2 %v515_v0 }
 0x25d   :  { %v531_v62 = vpop.f32.mrf.mxu2 }
 0x25e   :  { %v532_v8 = vadd.f32 %v531_v62, %v520_v7 }
 0x260   :  { %v631_v9 = vmul.f32 -1.442695, %v532_v8 }
 0x262   :  { %661 = vpow2.f32 %v631_v9 }
 0x265   :  { %v533_v10 = vpop.f32.mrf.mxu2 }
 0x268   :  { %v662_v60 = vpop.eup %661 }
 0x269   :  { %v538_v11 = vadd.f32 1.0, %v662_v60 }
 0x26b   :  { %663 = vrcp.f32 %v538_v11  ;;  %v550_v15 = vand.u32 2147483648, %v538_v11  ;;  %v548_v17 = vand.u32 2147483647, %v538_v11  ;;  %vm544_vm3 = vweird.f32 %v538_v11 }
 0x26d   :  { %v551_v19 = vor.u32 1.1754944e-38, %v550_v15  ;;  %vm549_vm5 = vcmp.eq.f32.partialorder %v548_v17, 8.507059e+37 }
 0x271   :  { %v664_v12 = vpop.eup %663 }
 0x272   :  { %v540_v13 = vmul.f32 %v664_v12, %v538_v11  ;;  %vm545_vm2 = vweird.f32 %v664_v12 }
 0x273   :  { %vm546_vm4 = vmor %vm544_vm3, %vm545_vm2 }
 0x274   :  { %v541_v14 = vsub.f32 1.0, %v540_v13 }
 0x276   :  { %v542_v16 = vmul.f32 %v664_v12, %v541_v14 }
 0x278   :  { %v543_v18 = vadd.f32 %v664_v12, %v542_v16 }
 0x27a   :  { %v547_v20 = vsel %vm546_vm4, %v664_v12, %v543_v18 }
 0x27b   :  { %v552_v21 = vsel %vm549_vm5, %v551_v19, %v547_v20 }
 0x27c   :  { %554 = vst [vmem:[%s883_s7] sm:$0x1] %v552_v21 }

</bundles_post_ra>
